<compile_context>
chip_gen: v6e
topology: v6e:2x2x1
jax: 0.10.0
libtpu: 0.0.40
codegen_flags: <defaults>
</compile_context>

<pallas_src>
import math

import jax
import jax.numpy as jnp
from jax.experimental import pallas as pl
from jax.experimental.pallas import tpu as pltpu


def _round_up(x, m):
    return ((x + m - 1) // m) * m


def _vmem_budget_bytes():
    """Usable VMEM budget for this chip (leaves headroom for compiler scratch)."""
    cap = 64 * 1024 * 1024  # conservative fallback (safe on every generation)
    try:
        info = pltpu.get_tpu_info()
        cap = int(getattr(info, "vmem_capacity_bytes", cap))
    except Exception:
        pass
    # <= 3/4 of physical VMEM, never above 96 MiB:
    #   v5e/v6e (128 MiB) -> 96 MiB, v7x (64 MiB) -> 48 MiB.
    return min(cap * 3 // 4, 96 * 1024 * 1024)


def _divisor_tiles(dim, align, target):
    """Descending tile sizes that divide `dim`, are multiples of `align`, and
    are <= `target`.  Falls back to [dim] (full extent) if none exist."""
    cands = [t for t in range(align, min(dim, target) + 1, align) if dim % t == 0]
    return sorted(cands, reverse=True) if cands else [dim]


def _cast_pad(x, dtype, shape):
    """Cast once, then pad once (skip pad when already aligned)."""
    if x.dtype != dtype:
        x = x.astype(dtype)
    pads = [(0, t - s) for s, t in zip(x.shape, shape)]
    if any(p[1] for p in pads):
        x = jnp.pad(x, pads)
    return x


def _make_matmul_kernel(*, resident_b, tk, use_acc):
    """out = A @ B + bias, reduced over grid axis 1.

    resident_b: B block is the full [K, Nc] array, sliced in-kernel with pl.ds.
    use_acc:    accumulate in a f32 VMEM scratch (needed when out dtype != f32);
                otherwise accumulate directly into out_ref (f32 output)."""

    def kernel(a_ref, b_ref, bias_ref, out_ref, *scratch):
        acc_ref = scratch[0] if use_acc else out_ref
        k = pl.program_id(1)

        @pl.when(k == 0)
        def _init():
            acc_ref[...] = jnp.zeros_like(acc_ref)

        if resident_b:
            off = pl.multiple_of(k * tk, 128)
            b_blk = b_ref[pl.ds(off, tk), :]
        else:
            b_blk = b_ref[...]

        acc_ref[...] += jnp.dot(
            a_ref[...], b_blk, preferred_element_type=jnp.float32
        )

        @pl.when(k == pl.num_programs(1) - 1)
        def _finalize():
            if use_acc:
                out_ref[...] = (acc_ref[...] + bias_ref[...]).astype(out_ref.dtype)
            else:
                out_ref[...] = acc_ref[...] + bias_ref[...]

    return kernel


def _tiled_matmul_bias(a, b, bias2d, out_dtype, *, vmem_budget, tm_target, tk_target):
    """a: [M, K], b: [K, Nc], bias2d: [1, Nc].  All dims pre-padded/aligned:
    M % 8 == 0, K % 128 == 0, Nc % 128 == 0.  Returns a @ b + bias."""
    M, K = a.shape
    K2, Nc = b.shape
    assert K2 == K and bias2d.shape == (1, Nc)

    a_item = jnp.dtype(a.dtype).itemsize
    b_item = jnp.dtype(b.dtype).itemsize
    o_item = jnp.dtype(out_dtype).itemsize

    use_acc = jnp.dtype(out_dtype) != jnp.dtype(jnp.float32)
    b_bytes = K * Nc * b_item
    # Keep B fully VMEM-resident when small (it is then DMA'd from HBM once,
    # instead of re-read once per row tile); otherwise stream (tk, Nc) slabs.
    resident_b = 2 * b_bytes <= max(vmem_budget // 3, 4 * 1024 * 1024)

    fit_budget = int(vmem_budget * 0.85)

    def working_set(tm, tk):
        s = 2 * tm * tk * a_item          # A, double-buffered
        s += 2 * tm * Nc * o_item         # out, double-buffered
        s += 2 * Nc * 4                   # bias
        if use_acc:
            s += tm * Nc * 4              # f32 accumulator
        s += 2 * b_bytes if resident_b else 2 * tk * Nc * b_item
        return s

    tm_cands = _divisor_tiles(M, 8, tm_target)
    tk_cands = _divisor_tiles(K, 128, tk_target)
    tm, tk = tm_cands[-1], tk_cands[-1]
    found = False
    for tm_c in tm_cands:                 # largest tiles first
        for tk_c in tk_cands:
            if working_set(tm_c, tk_c) <= fit_budget:
                tm, tk = tm_c, tk_c
                found = True
                break
        if found:
            break

    grid = (M // tm, K // tk)

    if resident_b:
        b_spec = pl.BlockSpec((K, Nc), lambda i, k: (0, 0))   # resident across grid
    else:
        b_spec = pl.BlockSpec((tk, Nc), lambda i, k: (k, 0))  # streamed slab

    kernel = _make_matmul_kernel(resident_b=resident_b, tk=tk, use_acc=use_acc)
    scratch = [pltpu.VMEM((tm, Nc), jnp.float32)] if use_acc else []

    flops = 2 * M * K * Nc
    bytes_accessed = (
        M * K * a_item
        + (b_bytes if resident_b else b_bytes * grid[0])
        + M * Nc * o_item
        + Nc * 4
    )

    return pl.pallas_call(
        kernel,
        out_shape=jax.ShapeDtypeStruct((M, Nc), out_dtype),
        grid=grid,
        in_specs=[
            pl.BlockSpec((tm, tk), lambda i, k: (i, k)),   # A row/reduction tile
            b_spec,                                        # B (resident or slab)
            pl.BlockSpec((1, Nc), lambda i, k: (0, 0)),    # bias (resident)
        ],
        out_specs=pl.BlockSpec((tm, Nc), lambda i, k: (i, 0)),
        scratch_shapes=scratch,
        compiler_params=pltpu.CompilerParams(
            dimension_semantics=("parallel", "arbitrary"),
            vmem_limit_bytes=int(vmem_budget),
        ),
        cost_estimate=pl.CostEstimate(
            flops=flops, transcendentals=0, bytes_accessed=int(bytes_accessed)
        ),
    )(a, b, bias2d)


def gcn_forward(X, adj, W, b=None, *, out_dtype=None, compute_dtype=None,
                _tile_targets=None):
    """GraphConvolution forward: adj @ (X @ W) + b.

    X: [N, F_in], adj: [N, N] (dense), W: [F_in, F_out], b: [F_out] or None.
    compute_dtype: optionally jnp.bfloat16 on v6e/v7x to halve the HBM-bound
    adjacency stream (f32 MXU accumulation is kept); default keeps f32
    end-to-end to match the original module's numerics.
    """
    N, f_in = X.shape
    f_in_w, f_out = W.shape
    assert f_in_w == f_in and adj.shape == (N, N)
    out_dtype = X.dtype if out_dtype is None else out_dtype
    in_dt = jnp.float32 if compute_dtype is None else jnp.dtype(compute_dtype)

    budget = _vmem_budget_bytes()
    if _tile_targets is None:
        # Smaller tiles on v7x (64 MiB VMEM); big tiles on v5e/v6e (128 MiB).
        tm_target, tk_target = (512, 1024) if budget < 56 * 1024 * 1024 else (1024, 2048)
    else:
        tm_target, tk_target = _tile_targets

    n_p = _round_up(N, 128)
    f_in_p = _round_up(f_in, 128)
    f_out_p = _round_up(f_out, 128)

    X_p = _cast_pad(X, in_dt, (n_p, f_in_p))
    W_p = _cast_pad(W, in_dt, (f_in_p, f_out_p))
    adj_p = _cast_pad(adj, in_dt, (n_p, n_p))

    if b is None:
        b_p = jnp.zeros((1, f_out_p), jnp.float32)
    else:
        b_p = _cast_pad(b.reshape(1, f_out), jnp.float32, (1, f_out_p))
    zero_bias = jnp.zeros((1, f_out_p), jnp.float32)

    # Stage 1: support = X @ W   (bias NOT added here, matching torch.mm).
    # Output stays in the compute dtype; W is tiny so it is VMEM-resident.
    xw = _tiled_matmul_bias(
        X_p, W_p, zero_bias, in_dt,
        vmem_budget=budget, tm_target=tm_target, tk_target=tk_target)

    # Stage 2: out = adj @ support + bias (f32 output, accumulate in out_ref).
    out_p = _tiled_matmul_bias(
        adj_p, xw, b_p, jnp.float32,
        vmem_budget=budget, tm_target=tm_target, tk_target=tk_target)

    return out_p[:N, :f_out].astype(out_dtype)


def init_gcn_params(key, in_features, out_features):
    """Mirror GraphConvolution.reset_parameters: U(-stdv, stdv), stdv=1/sqrt(F_out)."""
    k_w, k_b = jax.random.split(key)
    stdv = 1.0 / math.sqrt(out_features)
    W = jax.random.uniform(k_w, (in_features, out_features), jnp.float32, -stdv, stdv)
    b = jax.random.uniform(k_b, (out_features,), jnp.float32, -stdv, stdv)
    return W, b


if __name__ == "__main__":
    key = jax.random.PRNGKey(0)
    k_x, k_adj, k_p = jax.random.split(key, 3)

    N = 200            # graph nodes (exercises padding + slicing back)
    in_features = 96
    out_features = 64

    X = jax.random.normal(k_x, (N, in_features), jnp.float32)
    adj = jax.random.uniform(k_adj, (N, N), jnp.float32)  # dense stand-in for sparse adj
    W, b = init_gcn_params(k_p, in_features, out_features)

    # Pure-JAX reference of the module's forward semantics.
    ref = adj @ (X @ W) + b

    # Default (auto-tiled) path.
    out = jax.block_until_ready(gcn_forward(X, adj, W, b))
    assert out.shape == (N, out_features)
    assert jnp.allclose(out, ref, atol=1e-3, rtol=1e-3), float(jnp.max(jnp.abs(out - ref)))

    # Small-tile path: exercises the multi-step k reduction, the pl.when
    # init/finalize branches, and in-kernel slicing of the resident B operand.
    out_small = jax.block_until_ready(gcn_forward(X, adj, W, b, _tile_targets=(64, 128)))
    assert jnp.allclose(out_small, ref, atol=1e-3, rtol=1e-3), \
        float(jnp.max(jnp.abs(out_small - ref)))

    print("KERNEL_OK")
</pallas_src>

<mosaic_0001>
module attributes {stable_mosaic.version = 11 : i64} {
  func.func @kernel(%arg0: i32, %arg1: i32, %arg2: memref<256x128xf32, #tpu.memory_space<vmem>>, %arg3: memref<128x128xf32, #tpu.memory_space<vmem>>, %arg4: memref<1x128xf32, #tpu.memory_space<vmem>>, %arg5: memref<256x128xf32, #tpu.memory_space<vmem>>) attributes {dimension_semantics = [#tpu.dimension_semantics<parallel>, #tpu.dimension_semantics<arbitrary>], iteration_bounds = array<i64: 1, 1>, scalar_prefetch = 0 : i64, scratch_operands = 0 : i64, tpu.core_type = #tpu.core_type<tc>, window_params = [{transform_indices = @transform_0, window_bounds = array<i64: 256, 128>}, {pipeline_mode = #tpu.pipeline_mode<synchronous>, transform_indices = @transform_1, window_bounds = array<i64: 128, 128>}, {pipeline_mode = #tpu.pipeline_mode<synchronous>, transform_indices = @transform_2, window_bounds = array<i64: 1, 128>}, {transform_indices = @transform_3, window_bounds = array<i64: 256, 128>}]} {
    %c0_i32 = arith.constant 0 : i32
    %0 = arith.cmpi eq, %arg1, %c0_i32 : i32
    %1 = arith.extui %0 : i1 to i32
    %c0_i32_0 = arith.constant 0 : i32
    %2 = arith.cmpi ne, %1, %c0_i32_0 : i32
    scf.if %2 {
      %cst_9 = arith.constant 0.000000e+00 : f32
      %15 = vector.broadcast %cst_9 : f32 to vector<256x128xf32>
      %c0_10 = arith.constant 0 : index
      %c0_11 = arith.constant 0 : index
      %16 = vector.load %arg5[%c0_10, %c0_11] : memref<256x128xf32, #tpu.memory_space<vmem>>, vector<256x128xf32>
      tpu.vector_store %arg5[%c0_10, %c0_11], %15 {strides = array<i32>} : memref<256x128xf32, #tpu.memory_space<vmem>>, vector<256x128xf32>,
    } else {
    }
    %c128_i32 = arith.constant 128 : i32
    %3 = arith.muli %arg1, %c128_i32 : i32
    %4 = tpu.assume_multiple %3, 128 : i32
    %5 = arith.index_cast %4 : i32 to index
    %c0 = arith.constant 0 : index
    %6 = vector.load %arg3[%5, %c0] : memref<128x128xf32, #tpu.memory_space<vmem>>, vector<128x128xf32>
    %c0_1 = arith.constant 0 : index
    %c0_2 = arith.constant 0 : index
    %7 = vector.load %arg5[%c0_1, %c0_2] : memref<256x128xf32, #tpu.memory_space<vmem>>, vector<256x128xf32>
    %c0_3 = arith.constant 0 : index
    %c0_4 = arith.constant 0 : index
    %8 = vector.load %arg2[%c0_3, %c0_4] : memref<256x128xf32, #tpu.memory_space<vmem>>, vector<256x128xf32>
    %cst = arith.constant dense<0.000000e+00> : vector<256x128xf32>
    %9 = tpu.matmul %8, %6, %cst {dimension_numbers = #tpu.dot_dimension_numbers<[1], [0], [0], [1], [0, 0, 1, 1], [], []>} : vector<256x128xf32>, vector<128x128xf32>, vector<256x128xf32> -> vector<256x128xf32>
    %10 = arith.addf %7, %9 : vector<256x128xf32>
    %c0_5 = arith.constant 0 : index
    %c0_6 = arith.constant 0 : index
    %11 = vector.load %arg5[%c0_5, %c0_6] : memref<256x128xf32, #tpu.memory_space<vmem>>, vector<256x128xf32>
    tpu.vector_store %arg5[%c0_5, %c0_6], %10 {strides = array<i32>} : memref<256x128xf32, #tpu.memory_space<vmem>>, vector<256x128xf32>,
    %c0_i32_7 = arith.constant 0 : i32
    %12 = arith.cmpi eq, %arg1, %c0_i32_7 : i32
    %13 = arith.extui %12 : i1 to i32
    %c0_i32_8 = arith.constant 0 : i32
    %14 = arith.cmpi ne, %13, %c0_i32_8 : i32
    scf.if %14 {
      %c0_9 = arith.constant 0 : index
      %c0_10 = arith.constant 0 : index
      %15 = vector.load %arg5[%c0_9, %c0_10] : memref<256x128xf32, #tpu.memory_space<vmem>>, vector<256x128xf32>
      %c0_11 = arith.constant 0 : index
      %c0_12 = arith.constant 0 : index
      %16 = vector.load %arg4[%c0_11, %c0_12] : memref<1x128xf32, #tpu.memory_space<vmem>>, vector<1x128xf32>
      %17 = vector.broadcast %16 : vector<1x128xf32> to vector<256x128xf32>
      %18 = arith.addf %15, %17 : vector<256x128xf32>
      %c0_13 = arith.constant 0 : index
      %c0_14 = arith.constant 0 : index
      %19 = vector.load %arg5[%c0_13, %c0_14] : memref<256x128xf32, #tpu.memory_space<vmem>>, vector<256x128xf32>
      tpu.vector_store %arg5[%c0_13, %c0_14], %18 {strides = array<i32>} : memref<256x128xf32, #tpu.memory_space<vmem>>, vector<256x128xf32>,
    } else {
    }
    return
  }
  func.func @transform_0(%arg0: i32, %arg1: i32) -> (i32, i32) {
    %c0_i32 = arith.constant 0 : i32
    return %arg0, %arg1 : i32, i32
  }
  func.func @transform_1(%arg0: i32, %arg1: i32) -> (i32, i32) {
    %c0_i32 = arith.constant 0 : i32
    %c0_i32_0 = arith.constant 0 : i32
    %c0_i32_1 = arith.constant 0 : i32
    return %c0_i32, %c0_i32_0 : i32, i32
  }
  func.func @transform_2(%arg0: i32, %arg1: i32) -> (i32, i32) {
    %c0_i32 = arith.constant 0 : i32
    %c0_i32_0 = arith.constant 0 : i32
    %c0_i32_1 = arith.constant 0 : i32
    return %c0_i32, %c0_i32_0 : i32, i32
  }
  func.func @transform_3(%arg0: i32, %arg1: i32) -> (i32, i32) {
    %c0_i32 = arith.constant 0 : i32
    %c0_i32_0 = arith.constant 0 : i32
    return %arg0, %c0_i32 : i32, i32
  }
}

</mosaic_0001>

<bundles_post_ra>
// kernel: tpu_custom_call.1
= control target key start
LH: loop header
LB: loop body
LE: loop exit
PB: predicated region body
PF: predicated region fallthrough
CT: control target
= control target key end

     0   :  { %8 = vsyncpa [#allocation3], 0  ;;  %s887_s0 = inlined_call_operand.hbm [shape: f32[256,128], index: 0, kind: input, shape index: {}]   ;;  %s888_s1 = inlined_call_operand.hbm [shape: f32[128,128], index: 1, kind: input, shape index: {}]   ;;  %s889_s2 = inlined_call_operand.vmem [shape: f32[1,128], index: 2, kind: input, shape index: {}]   ;;  %s890_s3 = inlined_call_operand.hbm [shape: f32[256,128], index: 3, kind: output, shape index: {}]  }
   0x1   :  { %9 = vsyncpa [#allocation6], 0 }
   0x2   :  { %10 = vsyncpa [#allocation4], 0  ;;  %s807_s12 = smov [#allocation2]  }
   0x3   :  { %s16_s13 = sshll.u32 %s807_s12, 4  ;;  %s17_s13 = int_to_ptr.vmem [resolvable:$true] %s16_s13 }
   0x4   :  { %s749_s14 = scalar_lea.vmem %s17_s13, 4096  ;;  %p754_p1 = scmp.lt.s32.totalorder %s17_s13, %s17_s13 }
   0x5   :  { %p750_p0 = scmp.ne.s32.totalorder %s17_s13, %s749_s14  ;;  %p755_p2 = scmp.lt.s32.totalorder %s749_s14, %s749_s14 }
   0x7   :  { %p756_p3 = por %p755_p2, %p754_p1 }
   0x9   :  { %p757_p4 = pnand %p756_p3, %p750_p0 }
   0xb   :  { %760 = shalt.err (!%p757_p4)
}
   0xc   :  { %s808_s15 = smov 128   ;;  %s809_s16 = smov 8  }
   0xd   :  { %22 = dma.hbm_to_vmem [thread:$0]  %s887_s0, 4096, %s17_s13, [#allocation3], %s808_s15, %s808_s15, %s809_s16  }
   0xe   :  { %s810_s19 = smov [#allocation5]  }
   0xf   :  { %s28_s20 = sshll.u32 %s810_s19, 4  ;;  %s29_s20 = int_to_ptr.vmem [resolvable:$true] %s28_s20 }
  0x10   :  { %s769_s21 = scalar_lea.vmem %s29_s20, 2048  ;;  %p774_p6 = scmp.lt.s32.totalorder %s29_s20, %s29_s20 }
  0x11   :  { %p770_p5 = scmp.ne.s32.totalorder %s29_s20, %s769_s21  ;;  %p775_p7 = scmp.lt.s32.totalorder %s769_s21, %s769_s21 }
  0x13   :  { %p776_p8 = por %p775_p7, %p774_p6 }
  0x15   :  { %p777_p9 = pnand %p776_p8, %p770_p5 }
  0x17   :  { %780 = shalt.err (!%p777_p9)
}
  0x18   :  { %34 = dma.hbm_to_vmem [thread:$0]  %s888_s1, 2048, %s29_s20, [#allocation6], %s808_s15, %s808_s15, %s809_s16  }
  0x19   :  { %801 = dma.done.wait [#allocation3], 4096  }
  0x1a   :  { %802 = vsyncadd [#allocation3], 4294963200 }
  0x1b   :  { %803 = dma.done.wait [#allocation6], 2048  }
  0x1c   :  { %804 = vsyncadd [#allocation6], 4294965248  ;;  %v96_v0 = vld [vmem:[#allocation5 + $0x78] sm:$0xff]  ;;  %v95_v1 = vld [vmem:[#allocation5 + $0x70] sm:$0xff] }
  0x1d   :  { %623 = vmatprep.subr.mxu0 %v96_v0  ;;  %703 = vmatprep.subr.mxu1 %v96_v0  ;;  %v94_v2 = vld [vmem:[#allocation5 + $0x68] sm:$0xff]  ;;  %v93_v3 = vld [vmem:[#allocation5 + $0x60] sm:$0xff]  ;;  %v92_v4 = vld [vmem:[#allocation5 + $0x58] sm:$0xff] }
  0x1e   :  { %624 = vmatpush3.msra.mxu0 %v96_v0  ;;  %719 = vmatpush3.msra.mxu1 %v96_v0  ;;  %v91_v5 = vld [vmem:[#allocation5 + $0x50] sm:$0xff]  ;;  %v90_v6 = vld [vmem:[#allocation5 + $0x48] sm:$0xff]  ;;  %v89_v7 = vld [vmem:[#allocation5 + $0x40] sm:$0xff] }
  0x1f   :  { %625 = vmatprep.subr.mxu0 %v95_v1  ;;  %704 = vmatprep.subr.mxu1 %v95_v1  ;;  %v88_v8 = vld [vmem:[#allocation5 + $0x38] sm:$0xff]  ;;  %v87_v9 = vld [vmem:[#allocation5 + $0x30] sm:$0xff]  ;;  %v86_v10 = vld [vmem:[#allocation5 + $0x28] sm:$0xff] }
  0x20   :  { %626 = vmatpush3.msra.mxu0 %v95_v1  ;;  %720 = vmatpush3.msra.mxu1 %v95_v1  ;;  %v85_v11 = vld [vmem:[#allocation5 + $0x20] sm:$0xff]  ;;  %v84_v12 = vld [vmem:[#allocation5 + $0x18] sm:$0xff]  ;;  %v83_v13 = vld [vmem:[#allocation5 + $0x10] sm:$0xff] }
  0x21   :  { %627 = vmatprep.subr.mxu0 %v94_v2  ;;  %705 = vmatprep.subr.mxu1 %v94_v2  ;;  %v82_v14 = vld [vmem:[#allocation5 + $0x8] sm:$0xff]  ;;  %v81_v15 = vld [vmem:[#allocation5] sm:$0xff]  ;;  %v131_v20 = vld [vmem:[#allocation2 + $0x10] sm:$0xff] }
  0x22   :  { %628 = vmatpush3.msra.mxu0 %v94_v2  ;;  %721 = vmatpush3.msra.mxu1 %v94_v2  ;;  %v129_v16 = vld [vmem:[#allocation2] sm:$0xff]  ;;  %v130_v18 = vld [vmem:[#allocation2 + $0x8] sm:$0xff]  ;;  %v147_v21 = vld [vmem:[#allocation2 + $0x90] sm:$0xff] }
  0x23   :  { %629 = vmatprep.subr.mxu0 %v93_v3  ;;  %706 = vmatprep.subr.mxu1 %v93_v3  ;;  %v145_v17 = vld [vmem:[#allocation2 + $0x80] sm:$0xff]  ;;  %v146_v19 = vld [vmem:[#allocation2 + $0x88] sm:$0xff]  ;;  %v132_v22 = vld [vmem:[#allocation2 + $0x18] sm:$0xff] }
  0x24   :  { %630 = vmatpush3.msra.mxu0 %v93_v3  ;;  %722 = vmatpush3.msra.mxu1 %v93_v3  ;;  %v148_v23 = vld [vmem:[#allocation2 + $0x98] sm:$0xff]  ;;  %v133_v24 = vld [vmem:[#allocation2 + $0x20] sm:$0xff]  ;;  %v134_v26 = vld [vmem:[#allocation2 + $0x28] sm:$0xff] }
  0x25   :  { %631 = vmatprep.subr.mxu0 %v92_v4  ;;  %707 = vmatprep.subr.mxu1 %v92_v4  ;;  %v149_v25 = vld [vmem:[#allocation2 + $0xa0] sm:$0xff]  ;;  %v150_v27 = vld [vmem:[#allocation2 + $0xa8] sm:$0xff]  ;;  %v135_v28 = vld [vmem:[#allocation2 + $0x30] sm:$0xff] }
  0x26   :  { %632 = vmatpush3.msra.mxu0 %v92_v4  ;;  %723 = vmatpush3.msra.mxu1 %v92_v4  ;;  %v151_v29 = vld [vmem:[#allocation2 + $0xb0] sm:$0xff]  ;;  %v136_v30 = vld [vmem:[#allocation2 + $0x38] sm:$0xff]  ;;  %v137_v32 = vld [vmem:[#allocation2 + $0x40] sm:$0xff] }
  0x27   :  { %633 = vmatprep.subr.mxu0 %v91_v5  ;;  %708 = vmatprep.subr.mxu1 %v91_v5  ;;  %v152_v31 = vld [vmem:[#allocation2 + $0xb8] sm:$0xff]  ;;  %v153_v33 = vld [vmem:[#allocation2 + $0xc0] sm:$0xff]  ;;  %v138_v34 = vld [vmem:[#allocation2 + $0x48] sm:$0xff] }
  0x28   :  { %634 = vmatpush3.msra.mxu0 %v91_v5  ;;  %724 = vmatpush3.msra.mxu1 %v91_v5  ;;  %v154_v35 = vld [vmem:[#allocation2 + $0xc8] sm:$0xff]  ;;  %v139_v36 = vld [vmem:[#allocation2 + $0x50] sm:$0xff]  ;;  %v140_v38 = vld [vmem:[#allocation2 + $0x58] sm:$0xff] }
  0x29   :  { %635 = vmatprep.subr.mxu0 %v90_v6  ;;  %709 = vmatprep.subr.mxu1 %v90_v6  ;;  %v155_v37 = vld [vmem:[#allocation2 + $0xd0] sm:$0xff]  ;;  %v156_v39 = vld [vmem:[#allocation2 + $0xd8] sm:$0xff]  ;;  %v141_v40 = vld [vmem:[#allocation2 + $0x60] sm:$0xff] }
  0x2a   :  { %636 = vmatpush3.msra.mxu0 %v90_v6  ;;  %725 = vmatpush3.msra.mxu1 %v90_v6  ;;  %v157_v41 = vld [vmem:[#allocation2 + $0xe0] sm:$0xff]  ;;  %v142_v42 = vld [vmem:[#allocation2 + $0x68] sm:$0xff]  ;;  %v143_v44 = vld [vmem:[#allocation2 + $0x70] sm:$0xff] }
  0x2b   :  { %637 = vmatprep.subr.mxu0 %v89_v7  ;;  %710 = vmatprep.subr.mxu1 %v89_v7  ;;  %v158_v43 = vld [vmem:[#allocation2 + $0xe8] sm:$0xff]  ;;  %v159_v45 = vld [vmem:[#allocation2 + $0xf0] sm:$0xff]  ;;  %v144_v46 = vld [vmem:[#allocation2 + $0x78] sm:$0xff] }
  0x2c   :  { %638 = vmatpush3.msra.mxu0 %v89_v7  ;;  %726 = vmatpush3.msra.mxu1 %v89_v7  ;;  %v160_v47 = vld [vmem:[#allocation2 + $0xf8] sm:$0xff]  ;;  %v847_v49 = vld [vmem:[%s889_s2] ss:$0 sm:$0xff]  ;;  %s811_s2 = smov [#allocation7]  }
  0x2d   :  { %639 = vmatprep.subr.mxu0 %v88_v8  ;;  %711 = vmatprep.subr.mxu1 %v88_v8  ;;  %s561_s24 = sshll.u32 %s811_s2, 4  ;;  %s562_s24 = int_to_ptr.vmem [resolvable:$true] %s561_s24 }
  0x2e   :  { %640 = vmatpush3.msra.mxu0 %v88_v8  ;;  %727 = vmatpush3.msra.mxu1 %v88_v8  ;;  %s781_s25 = scalar_lea.vmem %s562_s24, 4096  ;;  %p786_p11 = scmp.lt.s32.totalorder %s562_s24, %s562_s24 }
  0x2f   :  { %641 = vmatprep.subr.mxu0 %v87_v9  ;;  %712 = vmatprep.subr.mxu1 %v87_v9  ;;  %p782_p10 = scmp.ne.s32.totalorder %s562_s24, %s781_s25  ;;  %p787_p12 = scmp.lt.s32.totalorder %s781_s25, %s781_s25 }
  0x30   :  { %642 = vmatpush3.msra.mxu0 %v87_v9  ;;  %728 = vmatpush3.msra.mxu1 %v87_v9 }
  0x31   :  { %643 = vmatprep.subr.mxu0 %v86_v10  ;;  %713 = vmatprep.subr.mxu1 %v86_v10  ;;  %p788_p13 = por %p787_p12, %p786_p11 }
  0x32   :  { %644 = vmatpush3.msra.mxu0 %v86_v10  ;;  %729 = vmatpush3.msra.mxu1 %v86_v10 }
  0x33   :  { %645 = vmatprep.subr.mxu0 %v85_v11  ;;  %714 = vmatprep.subr.mxu1 %v85_v11  ;;  %p789_p0 = pnand %p788_p13, %p782_p10 }
  0x34   :  { %646 = vmatpush3.msra.mxu0 %v85_v11  ;;  %730 = vmatpush3.msra.mxu1 %v85_v11 }
  0x35   :  { %647 = vmatprep.subr.mxu0 %v84_v12  ;;  %715 = vmatprep.subr.mxu1 %v84_v12 }
  0x36   :  { %648 = vmatpush3.msra.mxu0 %v84_v12  ;;  %731 = vmatpush3.msra.mxu1 %v84_v12 }
  0x37   :  { %649 = vmatprep.subr.mxu0 %v83_v13  ;;  %716 = vmatprep.subr.mxu1 %v83_v13 }
  0x38   :  { %650 = vmatpush3.msra.mxu0 %v83_v13  ;;  %732 = vmatpush3.msra.mxu1 %v83_v13 }
  0x39   :  { %651 = vmatprep.subr.mxu0 %v82_v14  ;;  %717 = vmatprep.subr.mxu1 %v82_v14 }
  0x3a   :  { %652 = vmatpush3.msra.mxu0 %v82_v14  ;;  %733 = vmatpush3.msra.mxu1 %v82_v14 }
  0x3b   :  { %653 = vmatprep.subr.mxu0 %v81_v15  ;;  %718 = vmatprep.subr.mxu1 %v81_v15 }
  0x3c   :  { %654 = vmatpush3.msra.mxu0 %v81_v15  ;;  %734 = vmatpush3.msra.mxu1 %v81_v15 }
  0x3d   :  { %655 = vmatprep.mubr.f32.mxu0 %v129_v16  ;;  %679 = vmatprep.mubr.f32.mxu1 %v145_v17 }
  0x3e   :  { %656 = vmatmul.mubr.f32.vlgmr.msra.gmra.mxu0 %v130_v18  ;;  %680 = vmatmul.mubr.f32.vlgmr.msra.gmra.mxu1 %v146_v19 }
  0x3f   :  { %658 = vmatprep.mubr.f32.mxu0 %v131_v20  ;;  %682 = vmatprep.mubr.f32.mxu1 %v147_v21 }
  0x42   :  { %659 = vmatmul.mubr.f32.gmra.mxu0 %v132_v22  ;;  %683 = vmatmul.mubr.f32.gmra.mxu1 %v148_v23 }
  0x43   :  { %661 = vmatprep.mubr.f32.mxu0 %v133_v24  ;;  %685 = vmatprep.mubr.f32.mxu1 %v149_v25 }
  0x46   :  { %662 = vmatmul.mubr.f32.gmra.mxu0 %v134_v26  ;;  %686 = vmatmul.mubr.f32.gmra.mxu1 %v150_v27 }
  0x47   :  { %664 = vmatprep.mubr.f32.mxu0 %v135_v28  ;;  %688 = vmatprep.mubr.f32.mxu1 %v151_v29 }
  0x4a   :  { %665 = vmatmul.mubr.f32.gmra.mxu0 %v136_v30  ;;  %689 = vmatmul.mubr.f32.gmra.mxu1 %v152_v31 }
  0x4b   :  { %667 = vmatprep.mubr.f32.mxu0 %v137_v32  ;;  %691 = vmatprep.mubr.f32.mxu1 %v153_v33 }
  0x4e   :  { %668 = vmatmul.mubr.f32.gmra.mxu0 %v138_v34  ;;  %692 = vmatmul.mubr.f32.gmra.mxu1 %v154_v35 }
  0x4f   :  { %670 = vmatprep.mubr.f32.mxu0 %v139_v36  ;;  %694 = vmatprep.mubr.f32.mxu1 %v155_v37 }
  0x52   :  { %671 = vmatmul.mubr.f32.gmra.mxu0 %v140_v38  ;;  %695 = vmatmul.mubr.f32.gmra.mxu1 %v156_v39 }
  0x53   :  { %673 = vmatprep.mubr.f32.mxu0 %v141_v40  ;;  %697 = vmatprep.mubr.f32.mxu1 %v157_v41 }
  0x56   :  { %674 = vmatmul.mubr.f32.gmra.mxu0 %v142_v42  ;;  %698 = vmatmul.mubr.f32.gmra.mxu1 %v158_v43 }
  0x57   :  { %676 = vmatprep.mubr.f32.mxu0 %v143_v44  ;;  %700 = vmatprep.mubr.f32.mxu1 %v159_v45 }
  0x5a   :  { %677 = vmatmul.mubr.f32.gmra.mxu0 %v144_v46  ;;  %701 = vmatmul.mubr.f32.gmra.mxu1 %v160_v47 }
  0xfe   :  { %v657_v48 = vpop.f32.mrf.mxu0  ;;  %v681_v50 = vpop.f32.mrf.mxu1 }
  0xff   :  { %v493_v53 = vadd.f32 %v657_v48, %v847_v49  ;;  %v509_v54 = vadd.f32 %v681_v50, %v847_v49 }
 0x100   :  { %v227_v51 = vpop.f32.mrf.mxu0  ;;  %v307_v52 = vpop.f32.mrf.mxu1 }
 0x101   :  { %525 = vst [vmem:[#allocation7 + $0x8] sm:$0xff] %v493_v53  ;;  %541 = vst [vmem:[#allocation7 + $0x88] sm:$0xff] %v509_v54  ;;  %v492_v57 = vadd.f32 %v847_v49, %v227_v51  ;;  %v508_v58 = vadd.f32 %v847_v49, %v307_v52 }
 0x102   :  { %v660_v55 = vpop.f32.mrf.mxu0  ;;  %v684_v56 = vpop.f32.mrf.mxu1 }
 0x103   :  { %524 = vst [vmem:[#allocation7] sm:$0xff] %v492_v57  ;;  %540 = vst [vmem:[#allocation7 + $0x80] sm:$0xff] %v508_v58  ;;  %v495_v61 = vadd.f32 %v660_v55, %v847_v49  ;;  %v511_v62 = vadd.f32 %v684_v56, %v847_v49 }
 0x104   :  { %v237_v59 = vpop.f32.mrf.mxu0  ;;  %v317_v60 = vpop.f32.mrf.mxu1 }
 0x105   :  { %527 = vst [vmem:[#allocation7 + $0x18] sm:$0xff] %v495_v61  ;;  %543 = vst [vmem:[#allocation7 + $0x98] sm:$0xff] %v511_v62  ;;  %v494_v1 = vadd.f32 %v847_v49, %v237_v59  ;;  %v510_v2 = vadd.f32 %v847_v49, %v317_v60 }
 0x106   :  { %v663_v63 = vpop.f32.mrf.mxu0  ;;  %v687_v0 = vpop.f32.mrf.mxu1 }
 0x107   :  { %526 = vst [vmem:[#allocation7 + $0x10] sm:$0xff] %v494_v1  ;;  %542 = vst [vmem:[#allocation7 + $0x90] sm:$0xff] %v510_v2  ;;  %v497_v5 = vadd.f32 %v663_v63, %v847_v49  ;;  %v513_v6 = vadd.f32 %v687_v0, %v847_v49 }
 0x108   :  { %v247_v3 = vpop.f32.mrf.mxu0  ;;  %v327_v4 = vpop.f32.mrf.mxu1 }
 0x109   :  { %529 = vst [vmem:[#allocation7 + $0x28] sm:$0xff] %v497_v5  ;;  %545 = vst [vmem:[#allocation7 + $0xa8] sm:$0xff] %v513_v6  ;;  %v496_v9 = vadd.f32 %v847_v49, %v247_v3  ;;  %v512_v10 = vadd.f32 %v847_v49, %v327_v4 }
 0x10a   :  { %v666_v7 = vpop.f32.mrf.mxu0  ;;  %v690_v8 = vpop.f32.mrf.mxu1 }
 0x10b   :  { %528 = vst [vmem:[#allocation7 + $0x20] sm:$0xff] %v496_v9  ;;  %544 = vst [vmem:[#allocation7 + $0xa0] sm:$0xff] %v512_v10  ;;  %v499_v13 = vadd.f32 %v666_v7, %v847_v49  ;;  %v515_v14 = vadd.f32 %v690_v8, %v847_v49 }
 0x10c   :  { %v257_v11 = vpop.f32.mrf.mxu0  ;;  %v337_v12 = vpop.f32.mrf.mxu1 }
 0x10d   :  { %531 = vst [vmem:[#allocation7 + $0x38] sm:$0xff] %v499_v13  ;;  %547 = vst [vmem:[#allocation7 + $0xb8] sm:$0xff] %v515_v14  ;;  %v498_v17 = vadd.f32 %v847_v49, %v257_v11  ;;  %v514_v18 = vadd.f32 %v847_v49, %v337_v12 }
 0x10e   :  { %v669_v15 = vpop.f32.mrf.mxu0  ;;  %v693_v16 = vpop.f32.mrf.mxu1 }
 0x10f   :  { %530 = vst [vmem:[#allocation7 + $0x30] sm:$0xff] %v498_v17  ;;  %546 = vst [vmem:[#allocation7 + $0xb0] sm:$0xff] %v514_v18  ;;  %v501_v21 = vadd.f32 %v669_v15, %v847_v49  ;;  %v517_v22 = vadd.f32 %v693_v16, %v847_v49 }
 0x110   :  { %v267_v19 = vpop.f32.mrf.mxu0  ;;  %v347_v20 = vpop.f32.mrf.mxu1 }
 0x111   :  { %533 = vst [vmem:[#allocation7 + $0x48] sm:$0xff] %v501_v21  ;;  %549 = vst [vmem:[#allocation7 + $0xc8] sm:$0xff] %v517_v22  ;;  %v500_v25 = vadd.f32 %v847_v49, %v267_v19  ;;  %v516_v26 = vadd.f32 %v847_v49, %v347_v20 }
 0x112   :  { %v672_v23 = vpop.f32.mrf.mxu0  ;;  %v696_v24 = vpop.f32.mrf.mxu1 }
 0x113   :  { %532 = vst [vmem:[#allocation7 + $0x40] sm:$0xff] %v500_v25  ;;  %548 = vst [vmem:[#allocation7 + $0xc0] sm:$0xff] %v516_v26  ;;  %v503_v29 = vadd.f32 %v672_v23, %v847_v49  ;;  %v519_v30 = vadd.f32 %v696_v24, %v847_v49 }
 0x114   :  { %v277_v27 = vpop.f32.mrf.mxu0  ;;  %v357_v28 = vpop.f32.mrf.mxu1 }
 0x115   :  { %535 = vst [vmem:[#allocation7 + $0x58] sm:$0xff] %v503_v29  ;;  %551 = vst [vmem:[#allocation7 + $0xd8] sm:$0xff] %v519_v30  ;;  %v502_v33 = vadd.f32 %v847_v49, %v277_v27  ;;  %v518_v34 = vadd.f32 %v847_v49, %v357_v28 }
 0x116   :  { %v675_v31 = vpop.f32.mrf.mxu0  ;;  %v699_v32 = vpop.f32.mrf.mxu1 }
 0x117   :  { %534 = vst [vmem:[#allocation7 + $0x50] sm:$0xff] %v502_v33  ;;  %550 = vst [vmem:[#allocation7 + $0xd0] sm:$0xff] %v518_v34  ;;  %v505_v37 = vadd.f32 %v675_v31, %v847_v49  ;;  %v521_v38 = vadd.f32 %v699_v32, %v847_v49 }
 0x118   :  { %v287_v35 = vpop.f32.mrf.mxu0  ;;  %v367_v36 = vpop.f32.mrf.mxu1 }
 0x119   :  { %537 = vst [vmem:[#allocation7 + $0x68] sm:$0xff] %v505_v37  ;;  %553 = vst [vmem:[#allocation7 + $0xe8] sm:$0xff] %v521_v38  ;;  %v504_v41 = vadd.f32 %v847_v49, %v287_v35  ;;  %v520_v42 = vadd.f32 %v847_v49, %v367_v36 }
 0x11a   :  { %v678_v39 = vpop.f32.mrf.mxu0  ;;  %v702_v40 = vpop.f32.mrf.mxu1 }
 0x11b   :  { %536 = vst [vmem:[#allocation7 + $0x60] sm:$0xff] %v504_v41  ;;  %552 = vst [vmem:[#allocation7 + $0xe0] sm:$0xff] %v520_v42  ;;  %v507_v45 = vadd.f32 %v678_v39, %v847_v49  ;;  %v523_v46 = vadd.f32 %v702_v40, %v847_v49 }
 0x11c   :  { %v297_v43 = vpop.f32.mrf.mxu0  ;;  %v377_v44 = vpop.f32.mrf.mxu1 }
 0x11d   :  { %539 = vst [vmem:[#allocation7 + $0x78] sm:$0xff] %v507_v45  ;;  %555 = vst [vmem:[#allocation7 + $0xf8] sm:$0xff] %v523_v46  ;;  %v506_v47 = vadd.f32 %v847_v49, %v297_v43  ;;  %v522_v48 = vadd.f32 %v847_v49, %v377_v44 }
 0x11f   :  { %538 = vst [vmem:[#allocation7 + $0x70] sm:$0xff] %v506_v47  ;;  %554 = vst [vmem:[#allocation7 + $0xf0] sm:$0xff] %v522_v48 }
 0x120   :  { %792 = shalt.err (!%p789_p0)
}
 0x121   :  { %567 = dma.vmem_to_hbm [thread:$0]  %s562_s24, 4096, %s890_s3, [#allocation4], %s808_s15, %s808_s15, %s809_s16  }
 0x122   :  { %805 = dma.done.wait [#allocation4], 4096  }
 0x123   :  { %806 = vsyncadd [#allocation4], 4294963200 }
 0x124   :  { %571 = vsyncpa [#allocation3], 1 }
 0x125   :  { %572 = vsyncpa [#allocation6], 1 }
 0x126   :  { %573 = vsyncpa [#allocation4], 1 }

</bundles_post_ra>
